<compile_context>
chip_gen: v7x
topology: tpu7x:2x2x1
jax: 0.10.0
libtpu: 0.0.40
codegen_flags: <defaults>
</compile_context>

<pallas_src>
import jax
import jax.numpy as jnp
from jax import lax
from jax.experimental import pallas as pl
from jax.experimental.pallas import tpu as pltpu


# ----------------------------- Pallas kernels ------------------------------

def _lateral_kernel(x_ref, w1_ref, b1_ref, o_ref):
    """1x1 conv + bias for one spatial row, written into a zero-padded row."""
    j = pl.program_id(1)
    nrows = pl.num_programs(1)                       # H + 2 (padded rows)
    x_row = x_ref[0, 0]                              # (W, Cin), bf16
    row = jnp.dot(x_row, w1_ref[...], preferred_element_type=jnp.float32)
    row = row + b1_ref[...].astype(jnp.float32)
    valid = jnp.logical_and(j >= 1, j <= nrows - 2)  # rows 0 / H+1 are padding
    row = jnp.where(valid, row, 0.0)
    zcol = jnp.zeros((1, row.shape[1]), row.dtype)   # W-padding columns
    o_ref[0, 0] = jnp.concatenate([zcol, row, zcol], axis=0).astype(o_ref.dtype)


def _lateral_topdown_kernel(x_ref, td_ref, w1_ref, b1_ref, selw_ref, o_ref):
    """1x1 conv + bias + fused nearest-upsampled top-down add, one row."""
    j = pl.program_id(1)
    nrows = pl.num_programs(1)
    Wc = selw_ref.shape[1]
    x_row = x_ref[0, 0]                              # (W, Cin), bf16
    row = jnp.dot(x_row, w1_ref[...], preferred_element_type=jnp.float32)
    # Top-down: row gather already done by the BlockSpec index_map (DMA
    # addressing); column duplication via one-hot selection matmul (MXU).
    td_int = td_ref[0, 0, pl.ds(1, Wc), :]           # (Wc, Cout) interior cols
    row = row + jnp.dot(selw_ref[...], td_int, preferred_element_type=jnp.float32)
    row = row + b1_ref[...].astype(jnp.float32)
    valid = jnp.logical_and(j >= 1, j <= nrows - 2)
    row = jnp.where(valid, row, 0.0)
    zcol = jnp.zeros((1, row.shape[1]), row.dtype)
    o_ref[0, 0] = jnp.concatenate([zcol, row, zcol], axis=0).astype(o_ref.dtype)


def _conv3x3_row_kernel(p0_ref, p1_ref, p2_ref, w3_ref, b3_ref, o_ref):
    """3x3 conv (stride 1, pad 1) for one output row from 3 padded rows."""
    W = o_ref.shape[2]
    Cout = o_ref.shape[3]
    rows = (p0_ref, p1_ref, p2_ref)
    acc = jnp.zeros((W, Cout), jnp.float32)
    for dy in range(3):
        prow = rows[dy][0, 0]                        # (W + 2, C), bf16
        for dx in range(3):
            acc = acc + jnp.dot(prow[dx:dx + W, :], w3_ref[dy, dx],
                                preferred_element_type=jnp.float32)
    o_ref[0, 0] = (acc + b3_ref[...].astype(jnp.float32)).astype(o_ref.dtype)


# ------------------------------ Pallas wrappers ----------------------------

def _lateral_level(x_nhwc, w1_io, b1_row, td_pad=None, selw=None,
                   store_dtype=jnp.bfloat16):
    """Per-level lateral 1x1 conv (+ optional fused top-down add).

    Returns last_inner embedded in a zero-padded (N, H+2, W+2, Cout) buffer,
    ready for the 3x3 kernel (no separate pad pass, no upsample tensor)."""
    N, H, W, Cin = x_nhwc.shape
    Cout = w1_io.shape[1]
    grid = (N, H + 2)

    x_spec = pl.BlockSpec(
        (1, 1, W, Cin), lambda n, j: (n, jnp.clip(j - 1, 0, H - 1), 0, 0))
    w1_spec = pl.BlockSpec((Cin, Cout), lambda n, j: (0, 0))
    b1_spec = pl.BlockSpec((1, Cout), lambda n, j: (0, 0))
    o_spec = pl.BlockSpec((1, 1, W + 2, Cout), lambda n, j: (n, j, 0, 0))
    out_shape = jax.ShapeDtypeStruct((N, H + 2, W + 2, Cout), store_dtype)
    cparams = pltpu.CompilerParams(
        dimension_semantics=("parallel", "parallel"))

    if td_pad is None:
        return pl.pallas_call(
            _lateral_kernel, out_shape=out_shape, grid=grid,
            in_specs=[x_spec, w1_spec, b1_spec], out_specs=o_spec,
            compiler_params=cparams,
        )(x_nhwc, w1_io, b1_row)

    Hc, Wc = td_pad.shape[1] - 2, td_pad.shape[2] - 2
    # PyTorch 'nearest': src_row = floor(dst_row * Hc / H); +1 for the pad row.
    td_spec = pl.BlockSpec(
        (1, 1, Wc + 2, Cout),
        lambda n, j: (n, jnp.clip((j - 1) * Hc // H + 1, 0, Hc + 1), 0, 0))
    selw_spec = pl.BlockSpec((W, Wc), lambda n, j: (0, 0))
    return pl.pallas_call(
        _lateral_topdown_kernel, out_shape=out_shape, grid=grid,
        in_specs=[x_spec, td_spec, w1_spec, b1_spec, selw_spec],
        out_specs=o_spec, compiler_params=cparams,
    )(x_nhwc, td_pad, w1_io, b1_row, selw)


def _conv3x3_level(li_pad, w3_taps, b3_row, out_dtype=jnp.float32):
    """3x3 conv over the zero-padded last_inner buffer (N, H+2, W+2, C)."""
    N, Hp, Wp, C = li_pad.shape
    H, W = Hp - 2, Wp - 2
    Cout = w3_taps.shape[-1]
    grid = (N, H)

    def row_spec(dy):
        return pl.BlockSpec((1, 1, Wp, C), lambda n, r: (n, r + dy, 0, 0))

    return pl.pallas_call(
        _conv3x3_row_kernel,
        out_shape=jax.ShapeDtypeStruct((N, H, W, Cout), out_dtype),
        grid=grid,
        in_specs=[row_spec(0), row_spec(1), row_spec(2),
                  pl.BlockSpec((3, 3, C, Cout), lambda n, r: (0, 0, 0, 0)),
                  pl.BlockSpec((1, Cout), lambda n, r: (0, 0))],
        out_specs=pl.BlockSpec((1, 1, W, Cout), lambda n, r: (n, r, 0, 0)),
        compiler_params=pltpu.CompilerParams(
            dimension_semantics=("parallel", "parallel")),
    )(li_pad, li_pad, li_pad, w3_taps, b3_row)


# ------------------------------- FPN forward -------------------------------

def fpn_forward(feats_nchw, params_torch, compute_dtype=jnp.bfloat16):
    """feats_nchw: dict 'feat0'..'feat{L-1}' of NCHW tensors.
    params_torch: (inner_w[(Cout,Cin,1,1)], inner_b, layer_w[(Cout,Cout,3,3)], layer_b)."""
    inner_w, inner_b, layer_w, layer_b = params_torch
    num = len(feats_nchw)
    feats = [jnp.transpose(feats_nchw[f"feat{i}"], (0, 2, 3, 1)).astype(compute_dtype)
             for i in range(num)]                                   # -> NHWC bf16
    w1 = [jnp.transpose(w[:, :, 0, 0]).astype(compute_dtype) for w in inner_w]
    b1 = [b.reshape(1, -1).astype(jnp.float32) for b in inner_b]
    # (Cout, Cin, kh, kw) -> (kh, kw, Cin, Cout): w3[dy, dx] is one tap's matrix.
    w3 = [jnp.transpose(w, (2, 3, 1, 0)).astype(compute_dtype) for w in layer_w]
    b3 = [b.reshape(1, -1).astype(jnp.float32) for b in layer_b]

    li_pad = _lateral_level(feats[-1], w1[-1], b1[-1], store_dtype=compute_dtype)
    results = [_conv3x3_level(li_pad, w3[-1], b3[-1])]
    for idx in range(num - 2, -1, -1):
        _, H, W, _ = feats[idx].shape
        Wc = li_pad.shape[2] - 2
        # One-hot column-selection matrix for nearest-neighbour W upsample.
        wi = (jnp.arange(W) * Wc) // W
        selw = (wi[:, None] == jnp.arange(Wc)[None, :]).astype(compute_dtype)
        li_pad = _lateral_level(feats[idx], w1[idx], b1[idx],
                                td_pad=li_pad, selw=selw,
                                store_dtype=compute_dtype)
        results.insert(0, _conv3x3_level(li_pad, w3[idx], b3[idx]))
    return [jnp.transpose(r, (0, 3, 1, 2)) for r in results]        # -> NCHW


# --------------------------- reference + params ----------------------------

def _ref_conv(x, w, b, padding):
    out = lax.conv_general_dilated(
        x, w, (1, 1), padding, dimension_numbers=("NCHW", "OIHW", "NCHW"))
    return out + b[None, :, None, None]


def ref_fpn(feats, params_torch):
    iw, ib, lw, lb = params_torch
    num = len(feats)
    last_inner = _ref_conv(feats[f"feat{num - 1}"], iw[-1], ib[-1], "VALID")
    results = [_ref_conv(last_inner, lw[-1], lb[-1], "SAME")]
    for idx in range(num - 2, -1, -1):
        lateral = _ref_conv(feats[f"feat{idx}"], iw[idx], ib[idx], "VALID")
        oh, ow = lateral.shape[-2:]
        _, _, h, w = last_inner.shape
        hi = (jnp.arange(oh) * h) // oh
        wi = (jnp.arange(ow) * w) // ow
        top = last_inner[:, :, hi][:, :, :, wi]
        last_inner = lateral + top
        results.insert(0, _ref_conv(last_inner, lw[idx], lb[idx], "SAME"))
    return results


def init_params(key, in_channels_list, out_channels):
    inner_w, inner_b, layer_w, layer_b = [], [], [], []
    for cin in in_channels_list:
        key, k1, k2, k3, k4 = jax.random.split(key, 5)
        inner_w.append(jax.random.normal(k1, (out_channels, cin, 1, 1),
                                         jnp.float32) * 0.1)
        inner_b.append(jax.random.normal(k2, (out_channels,), jnp.float32) * 0.1)
        layer_w.append(jax.random.normal(k3, (out_channels, out_channels, 3, 3),
                                         jnp.float32) * 0.1)
        layer_b.append(jax.random.normal(k4, (out_channels,), jnp.float32) * 0.1)
    return inner_w, inner_b, layer_w, layer_b


# ----------------------------------- main -----------------------------------

if __name__ == "__main__":
    key = jax.random.PRNGKey(0)
    in_channels_list = [4, 8, 16, 32]
    out_channels = 8
    batch = 2
    sizes = [16, 8, 4, 2]

    kf, kp = jax.random.split(key)
    fkeys = jax.random.split(kf, 4)
    feats = {
        f"feat{i}": jax.random.normal(
            fkeys[i], (batch, in_channels_list[i], sizes[i], sizes[i]),
            jnp.float32)
        for i in range(4)
    }
    params = init_params(kp, in_channels_list, out_channels)

    outs = jax.block_until_ready(fpn_forward(feats, params))
    refs = ref_fpn(feats, params)

    for o, r in zip(outs, refs):
        assert o.shape == r.shape, (o.shape, r.shape)
        err = float(jnp.max(jnp.abs(o - r)))
        # bf16 activations/weights with f32 accumulation -> loosened tolerance.
        assert jnp.allclose(o, r, atol=5e-2, rtol=5e-2), err

    print("KERNEL_OK")
</pallas_src>

<mosaic_0001>
module attributes {stable_mosaic.version = 11 : i64} {
  func.func @_lateral_kernel(%arg0: i32, %arg1: i32, %arg2: memref<1x1x2x32xbf16, #tpu.memory_space<vmem>>, %arg3: memref<32x8xbf16, #tpu.memory_space<vmem>>, %arg4: memref<1x8xf32, #tpu.memory_space<vmem>>, %arg5: memref<1x1x4x8xbf16, #tpu.memory_space<vmem>>) attributes {dimension_semantics = [#tpu.dimension_semantics<parallel>, #tpu.dimension_semantics<parallel>], iteration_bounds = array<i64: 2, 4>, scalar_prefetch = 0 : i64, scratch_operands = 0 : i64, tpu.core_type = #tpu.core_type<tc>, window_params = [{transform_indices = @transform_0, window_bounds = array<i64: 1, 1, 2, 32>}, {pipeline_mode = #tpu.pipeline_mode<synchronous>, transform_indices = @transform_1, window_bounds = array<i64: 32, 8>}, {pipeline_mode = #tpu.pipeline_mode<synchronous>, transform_indices = @transform_2, window_bounds = array<i64: 1, 8>}, {transform_indices = @transform_3, window_bounds = array<i64: 1, 1, 4, 8>}]} {
    %c0 = arith.constant 0 : index
    %c0_0 = arith.constant 0 : index
    %c0_1 = arith.constant 0 : index
    %c0_2 = arith.constant 0 : index
    %0 = vector.load %arg2[%c0, %c0_0, %c0_1, %c0_2] : memref<1x1x2x32xbf16, #tpu.memory_space<vmem>>, vector<1x1x2x32xbf16>
    %1 = vector.shape_cast %0 : vector<1x1x2x32xbf16> to vector<2x32xbf16>
    %c0_3 = arith.constant 0 : index
    %c0_4 = arith.constant 0 : index
    %2 = vector.load %arg3[%c0_3, %c0_4] : memref<32x8xbf16, #tpu.memory_space<vmem>>, vector<32x8xbf16>
    %cst = arith.constant dense<0.000000e+00> : vector<2x8xf32>
    %3 = tpu.matmul %1, %2, %cst {dimension_numbers = #tpu.dot_dimension_numbers<[1], [0], [0], [1], [0, 0, 1, 1], [], []>} : vector<2x32xbf16>, vector<32x8xbf16>, vector<2x8xf32> -> vector<2x8xf32>
    %c0_5 = arith.constant 0 : index
    %c0_6 = arith.constant 0 : index
    %4 = vector.load %arg4[%c0_5, %c0_6] : memref<1x8xf32, #tpu.memory_space<vmem>>, vector<1x8xf32>
    %5 = vector.broadcast %4 : vector<1x8xf32> to vector<2x8xf32>
    %6 = arith.addf %3, %5 : vector<2x8xf32>
    %c1_i32 = arith.constant 1 : i32
    %7 = arith.cmpi sge, %arg1, %c1_i32 : i32
    %c2_i32 = arith.constant 2 : i32
    %8 = arith.cmpi sle, %arg1, %c2_i32 : i32
    %9 = arith.andi %7, %8 : i1
    %cst_7 = arith.constant 0.000000e+00 : f32
    %10 = vector.broadcast %cst_7 : f32 to vector<2x8xf32>
    %11 = arith.select %9, %6, %10 : vector<2x8xf32>
    %cst_8 = arith.constant 0.000000e+00 : f32
    %12 = vector.broadcast %cst_8 : f32 to vector<1x8xf32>
    %13 = tpu.concatenate %12, %11, %12 in 0 : vector<1x8xf32>, vector<2x8xf32>, vector<1x8xf32> -> vector<4x8xf32>
    %14 = arith.truncf %13 : vector<4x8xf32> to vector<4x8xbf16>
    %c0_9 = arith.constant 0 : index
    %c0_10 = arith.constant 0 : index
    %c0_11 = arith.constant 0 : index
    %c0_12 = arith.constant 0 : index
    %15 = vector.load %arg5[%c0_9, %c0_10, %c0_11, %c0_12] : memref<1x1x4x8xbf16, #tpu.memory_space<vmem>>, vector<1x1x4x8xbf16>
    %16 = vector.shape_cast %15 : vector<1x1x4x8xbf16> to vector<4x8xbf16>
    %17 = vector.shape_cast %14 : vector<4x8xbf16> to vector<1x1x4x8xbf16>
    tpu.vector_store %arg5[%c0_9, %c0_10, %c0_11, %c0_12], %17 {strides = array<i32>} : memref<1x1x4x8xbf16, #tpu.memory_space<vmem>>, vector<1x1x4x8xbf16>,
    return
  }
  func.func @transform_0(%arg0: i32, %arg1: i32) -> (i32, i32, i32, i32) {
    %c1_i32 = arith.constant 1 : i32
    %0 = arith.subi %arg1, %c1_i32 : i32
    %c0_i32 = arith.constant 0 : i32
    %c1_i32_0 = arith.constant 1 : i32
    %1 = arith.maxsi %c0_i32, %0 : i32
    %2 = arith.minsi %c1_i32_0, %1 : i32
    %c0_i32_1 = arith.constant 0 : i32
    %c0_i32_2 = arith.constant 0 : i32
    %c0_i32_3 = arith.constant 0 : i32
    return %arg0, %2, %c0_i32_1, %c0_i32_2 : i32, i32, i32, i32
  }
  func.func @transform_1(%arg0: i32, %arg1: i32) -> (i32, i32) {
    %c0_i32 = arith.constant 0 : i32
    %c0_i32_0 = arith.constant 0 : i32
    %c0_i32_1 = arith.constant 0 : i32
    return %c0_i32, %c0_i32_0 : i32, i32
  }
  func.func @transform_2(%arg0: i32, %arg1: i32) -> (i32, i32) {
    %c0_i32 = arith.constant 0 : i32
    %c0_i32_0 = arith.constant 0 : i32
    %c0_i32_1 = arith.constant 0 : i32
    return %c0_i32, %c0_i32_0 : i32, i32
  }
  func.func @transform_3(%arg0: i32, %arg1: i32) -> (i32, i32, i32, i32) {
    %c0_i32 = arith.constant 0 : i32
    %c0_i32_0 = arith.constant 0 : i32
    %c0_i32_1 = arith.constant 0 : i32
    return %arg0, %arg1, %c0_i32, %c0_i32_0 : i32, i32, i32, i32
  }
}

</mosaic_0001>

<bundles_post_ra>
// kernel: tpu_custom_call.1
= control target key start
LH: loop header
LB: loop body
LE: loop exit
PB: predicated region body
PF: predicated region fallthrough
CT: control target
= control target key end

     0   :  { %8 = vsyncpa [#allocation3], 0  ;;  %s797_s0 = inlined_call_operand.vmem [shape: bf16[2,2,2,32], index: 0, kind: input, shape index: {}]   ;;  %s798_s1 = inlined_call_operand.vmem [shape: bf16[32,8], index: 1, kind: input, shape index: {}]   ;;  %s799_s2 = inlined_call_operand.vmem [shape: f32[1,8], index: 2, kind: input, shape index: {}]   ;;  %s800_s3 = inlined_call_operand.hbm [shape: bf16[2,4,4,8], index: 3, kind: output, shape index: {}]  }
   0x1   :  { %10 = vsyncpa [#allocation3 + $0x1], 0  ;;  %s650_s12 = smov 0   ;;  %s652_s13 = smov 0  }
   0x2   :  { %s654_s14 = smov 0   ;;  %s656_s15 = smov 0  }
   0x3   :  { %s658_s16 = smov 0   ;;  %s660_s17 = smov 0  }
   0x4   :  { %s662_s18 = smov 0   ;;  %s664_s19 = smov 0  }
   0x5 LB: > { %s404_s20 = sadd.s32 4294967295, %s625_s19   ;;  %s405_s21 = sadd.s32 4294967294, %s625_s19   ;;  %s625_s19 = sphi %s664_s19, %s16_s19   ;;  %s621_s18 = sphi %s662_s18, %s809_s18   ;;  %s617_s17 = sphi %s660_s17, %s808_s17   ;;  %s613_s16 = sphi %s658_s16, %s807_s16   ;;  %s609_s15 = sphi %s656_s15, %s806_s15   ;;  %s605_s14 = sphi %s654_s14, %s805_s14   ;;  %s601_s13 = sphi %s652_s13, %s804_s13   ;;  %s597_s12 = sphi %s650_s12, %s803_s12  }
   0x6   : > { %s25_s22 = sadd.s32 1, %s617_s17  ;;  %s28_s23 = sadd.s32 1, %s621_s18 }
   0x7   : > { %p26_p0 = scmp.ge.s32.totalorder %s25_s22, 4  ;;  %p127_p1 = scmp.ne.s32.totalorder %s605_s14, %s601_s13 }
   0x8   : > { %p128_p2 = scmp.eq.s32.totalorder %s404_s20, 7  ;;  %p133_p5 = scmp.ne.s32.totalorder %s601_s13, %s597_s12 }
   0x9   : > { %s811_s22 = smov (%p26_p0, %s25_s22), 0  ;;  %s813_s23 = smov (!%p26_p0, %s28_s23), %s621_s18 }
   0xa   : > { %s113_s24 = ssub.s32 %s617_s17, %s811_s22  ;;  %p701_p3 = por %p128_p2, %p127_p1 }
   0xb   : > { %p30_p4 = scmp.ge.s32.totalorder %s813_s23, 2  ;;  %p134_p6 = scmp.eq.s32.totalorder %s405_s21, 7 }
   0xc   : > { %p420_p7 = scmp.ge.s32.totalorder %s625_s19, 1  ;;  %p178_p9 = scmp.lt.s32.totalorder %s625_s19, 9 }
   0xd   : > { %s815_s23 = smov (%p30_p4, %s813_s23), 0  ;;  %p710_p8 = por %p134_p6, %p133_p5 }
   0xe   : > { %s112_s27 = ssub.s32 %s621_s18, %s815_s23  ;;  %s117_s28 = sadd.s32 1, %s605_s14 }
   0xf   : > { %s114_s29 = sor.u32 %s113_s24, %s112_s27  ;;  %p179_p10 = pnand %p420_p7, %p178_p9 }
  0x10   : > { %p115_p11 = scmp.eq.s32.totalorder %s114_s29, 0  ;;  %v529_v0 = vld [vmem:[%s798_s1] sm:$0xff] (!%p179_p10)   ;;  %v627_v1 = vmov (!%p179_p10), 0.0   ;;  %v530_v2 = vld [vmem:[%s798_s1 + $0x8] sm:$0xff] (!%p179_p10)   ;;  %vm628_vm0 = vmmov (!%p179_p10), 0   ;;  %s422_s8 = sadd.s32 (!%p179_p10), 4294967295, %s609_s15 }
  0x11   : > { %182 = sbr.rel (%p179_p10) target bundleno = 268 (0x10c), region = 32  ;;  %448 = vmatprep.subr.bf16.mxu0 (!%p179_p10), %v627_v1  ;;  %452 = vmatprep.mubr.msk.bf16.mxu0 (!%p179_p10), %vm628_vm0, %v627_v1  ;;  %p214_p12 = scmp.lt.s32.totalorder (!%p179_p10), %s613_s16, 1  ;;  %vm251_vm1 = vcmask (!%p179_p10), 261120   ;;  %v429_v5 = vld [vmem:[%s799_s2] ss:$0 sm:$0xff] (!%p179_p10)  ;;  %vm306_vm3 = vcmask (!%p179_p10), 1040384  }
  0x12   : > { %s719_s30 = scalar_select %p115_p11, %s605_s14, %s117_s28  }
  0x13   : > { %449 = vmatpush3.bf16.msra.mxu0 (!%p179_p10), %v529_v0  ;;  %p210_p13 = scmp.gt.s32.totalorder (!%p179_p10), %s422_s8, 0  ;;  %p423_p0 = scmp.lt.s32.totalorder (!%p179_p10), %s422_s8, 1  ;;  %vm308_vm4 = vcmask (!%p179_p10), 1042432   ;;  %vm311_vm5 = vcmask (!%p179_p10), 58368  }
  0x14   : > { %450 = vmatprep.subr.bf16.mxu0 (!%p179_p10), %v627_v1  ;;  %p295_p2 = scmp.ge.s32.totalorder (!%p179_p10), %s609_s15, 1  ;;  %p296_p4 = scmp.le.s32.totalorder (!%p179_p10), %s609_s15, 2 }
  0x15   : > { %s206_s28 = sand.u32 (!%p179_p10), 1, %s601_s13   ;;  %s435_s6 = sshll.u32 (!%p179_p10), %s613_s16, 2 }
  0x16   : > { %p297_p5 = pnand (!%p179_p10), %p296_p4, %p295_p2  ;;  %s421_s5 = sshll.u32 (!%p179_p10), %s206_s28, 1 }
  0x17   : > { %451 = vmatpush3.bf16.msra.mxu0 (!%p179_p10), %v530_v2  ;;  %s325_s7 = sadd.s32 (!%p179_p10), %s609_s15, %s435_s6  ;;  %s314_s15 = scalar_lea.sflag (!%p179_p10), [#allocation3], %s206_s28 }
  0x18   : > { %s817_s8 = smov (!%p210_p13, %s422_s8), 0 }
  0x19   : > { %s215_s9 = scalar_select %p214_p12, %s613_s16, 1 }
  0x1a   : > { %s819_s8 = smov (!%p423_p0, %s817_s8), 1 }
  0x1b   : > { %p216_p1 = scmp.lt.s32.totalorder %s819_s8, 1  ;;  %s428_s10 = sshll.u32 %s215_s9, 1 }
  0x1c   : > { %s433_s27 = scalar_select %p297_p5, 0, 1 }
  0x1d   : > { %s821_s8 = smov (!%p216_p1, %s819_s8), 1  ;;  %s208_s9 = scalar_lea.vmem [#allocation2], %s421_s5 }
  0x1e   : > { %s219_s11 = sadd.s32 %s428_s10, %s821_s8  ;;  %v300_v4 = vstv %s433_s27  ;;  %s436_s8 = sshll.u32 %s325_s7, 5 }
  0x1f   : > { %s220_s24 = scalar_lea.vmem %s797_s0, %s219_s11  ;;  %vm301_vm2 = vcmp.eq.s32.totalorder %v300_v4, 1  ;;  %s329_s10 = sshll.u32 %s208_s9, 4  ;;  %s746_s10 = int_to_ptr.vmem [resolvable:$true] %s329_s10 }
  0x20   : > { %v227_v3 = vld [vmem:[%s220_s24] sm:$0x1]  ;;  %s744_s20 = scalar_lea.hbm %s800_s3, %s436_s8  ;;  %s531_s21 = scalar_lea.vmem %s746_s10, 32 }
  0x21   : > { %453 = vmatmul.mubr.msk.bf16.vlgmr.msra.gmra.mrb[0].mxu0 %vm251_vm1, %v227_v3  ;;  %p532_p6 = scmp.ne.s32.totalorder %s746_s10, %s531_s21  ;;  %s629_s24 = smov [#allocation2]  }
  0x22   : > { %s535_s27 = sshll.u32 %s629_s24, 4  ;;  %s536_s27 = int_to_ptr.vmem [resolvable:$false] %s535_s27 }
  0x23   : > { %p533_p7 = pnand %p532_p6, %p701_p3  ;;  %s537_s29 = scalar_lea.vmem %s536_s27, 64 }
  0x24   : > { %p538_p10 = scmp.lt.s32.totalorder %s746_s10, %s536_s27  ;;  %p539_p11 = scmp.lt.s32.totalorder %s537_s29, %s531_s21 }
  0x25   : > { %p534_p9 = pneg %p533_p7 }
  0x26   : > { %p540_p12 = por %p539_p11, %p538_p10 }
  0x28   : > { %p541_p13 = pnand %p540_p12, %p534_p9 }
  0xf4   : > { %v289_v6 = vpop.f32.mrb[0].mxu0 }
  0xf5   : > { %v290_v7 = vadd.f32 %v429_v5, %v289_v6  ;;  %v454_v8 = vpop.f32.mrb[1].mxu0 }
  0xf6   : > { %v292_v9 = vpop.f32.mrb[2].mxu0 }
  0xf7   : > { %v302_v10 = vsel %vm301_vm2, %v290_v7, 0.0  ;;  %v455_v11 = vpop.f32.mrb[3].mxu0 }
  0xf8   : > { %v304_v12 = vrot.slane %v302_v10, 7 }
  0xfa   : > { %v307_v13 = vsel %vm306_vm3, 0.0, %v304_v12 }
  0xfb   : > { %v309_v14 = vsel %vm308_vm4, %v307_v13, 0.0 }
  0xfc   : > { %v310_v15 = vpack.c.bf16 %v309_v14, %v309_v14 }
  0xfe   : > { %312 = vst.msk [vmem:[%s208_s9] sm:$0x3] %vm311_vm5, %v310_v15 }
  0xff   : > { %544 = shalt.err (!%p541_p13)
}
 0x100   : > { %s545_s28 = scalar_lea.hbm %s744_s20, 32  ;;  %s549_s6 = scalar_lea.hbm %s800_s3, 256 }
 0x101   : > { %p546_p0 = scmp.ne.s32.totalorder %s744_s20, %s545_s28  ;;  %p550_p4 = scmp.lt.u32.totalorder %s744_s20, %s800_s3 }
 0x102   : > { %p551_p5 = scmp.lt.u32.totalorder %s549_s6, %s545_s28  ;;  %p553_p7 = scmp.lt.u32.totalorder %s545_s28, %s744_s20 }
 0x103   : > { %p547_p1 = pnand %p546_p0, %p701_p3 }
 0x104   : > { %p552_p6 = por %p551_p5, %p550_p4 }
 0x105   : > { %p548_p2 = pneg %p547_p1 }
 0x106   : > { %p554_p9 = por %p553_p7, %p552_p6 }
 0x108   : > { %p555_p10 = pnand %p554_p9, %p548_p2 }
 0x10a   : > { %558 = shalt.err (!%p555_p10)
}
 0x10b   : > { %456 = dma.vmem_to_hbm [thread:$0]  (%p701_p3), %s746_s10, 32, %s744_s20, %s314_s15  }
 0x10c PF: > { %p462_p11 = scmp.ge.s32.totalorder %s625_s19, 2  ;;  %s341_s9 = sand.u32 1, %s597_s12  }
 0x10d   : > { %s342_s16 = scalar_lea.sflag [#allocation3], %s341_s9 }
 0x10e   : > { %p459_p12 = pnand %p462_p11, %p710_p8 }
 0x110   : > { %592 = dma.done.wait (!%p459_p12), %s342_s16, 32  }
 0x111   : > { %594 = vsyncadd (!%p459_p12), %s342_s16, 4294967264  ;;  %s16_s19 = sadd.s32 1, %s625_s19   ;;  %s803_s12 = smov %s601_s13 }
 0x112   : > { %p13_p13 = scmp.ge.s32.totalorder %s16_s19, 10   ;;  %s804_s13 = smov %s605_s14 }
 0x113   : > { %s805_s14 = smov %s719_s30  ;;  %s806_s15 = smov %s617_s17 }
 0x114   : > { %s807_s16 = smov %s621_s18  ;;  %s808_s17 = smov %s811_s22 }
 0x115   : > { %s809_s18 = smov %s815_s23  ;;  %15 = sbr.rel (!%p13_p13) target bundleno = 5 (0x5), region = 67 }
 0x11c   :  { %347 = vsyncpa [#allocation3], 1 }
 0x11d   :  { %349 = vsyncpa [#allocation3 + $0x1], 1 }

</bundles_post_ra>
